<compile_context>
chip_gen: v7x
topology: tpu7x:2x2x1
jax: 0.10.0
libtpu: 0.0.40
codegen_flags: <defaults>
</compile_context>

<pallas_src>
import functools

import jax
import jax.numpy as jnp
from jax.experimental import pallas as pl
from jax.experimental.pallas import tpu as pltpu

_LANES = 512                     # lane-dense width (multiple of 128) -> unmasked vst
_TILE_ROWS = 2048                # 2048 * 512 * 4B = 4 MiB per f32 tile
_VMEM_LIMIT = 32 * 1024 * 1024   # double-buffered in+out tiles fit on v5e/v6e/v7x


def _sum_kernel(x_ref, mean_ref, acc_ref, *, inv_n):
    i = pl.program_id(0)

    @pl.when(i == 0)
    def _init():
        acc_ref[...] = jnp.zeros_like(acc_ref)

    # Partial sum along the sublane axis (mostly VPU adds); keep a (1, LANES)
    # accumulator so the cross-lane reduce runs exactly once, at finalize.
    acc_ref[...] += jnp.sum(x_ref[...].astype(jnp.float32), axis=0, keepdims=True)

    @pl.when(i == pl.num_programs(0) - 1)
    def _finalize():
        # Multiply by the compile-time constant 1/n instead of dividing.
        mean_ref[...] = jnp.sum(acc_ref[...], keepdims=True) * inv_n


def _subtract_kernel(mean_ref, x_ref, o_ref):
    mean = mean_ref[0, 0]  # scalar read from SMEM, broadcast by the VPU
    o_ref[...] = (x_ref[...].astype(jnp.float32) - mean).astype(o_ref.dtype)


def centered_layer(x):
    """x - x.mean() over ALL elements (matches PyTorch CenteredLayer)."""
    orig_shape = x.shape
    orig_dtype = x.dtype
    total = 1
    for d in orig_shape:
        total *= d

    # ---- lane-dense 2-D view (rows, 512), row axis tiled ------------------
    flat = x.reshape(total)
    padded_total = pl.cdiv(total, _LANES) * _LANES
    rows = padded_total // _LANES
    if rows > _TILE_ROWS:
        tile_rows = _TILE_ROWS                       # 4 MiB tiles, multiple of 8
        rows = pl.cdiv(rows, tile_rows) * tile_rows  # pad rows to a whole tile
        padded_total = rows * _LANES
    else:
        tile_rows = rows                             # single full-extent tile

    if padded_total != total:
        # Zero padding: contributes 0 to the sum; the mean divides by the TRUE
        # n, and the padded tail is sliced off after the subtract pass.
        flat = jnp.pad(flat, (0, padded_total - total))
    x2d = flat.reshape(rows, _LANES)
    num_tiles = rows // tile_rows

    # ---- pass 1: global sum -> mean (f32), reduction axis "arbitrary" -----
    mean = pl.pallas_call(
        functools.partial(_sum_kernel, inv_n=1.0 / float(total)),
        out_shape=jax.ShapeDtypeStruct((1, 1), jnp.float32),
        grid=(num_tiles,),
        in_specs=[pl.BlockSpec((tile_rows, _LANES), lambda i: (i, 0))],
        out_specs=pl.BlockSpec((1, 1), lambda i: (0, 0)),
        scratch_shapes=[pltpu.VMEM((1, _LANES), jnp.float32)],
        compiler_params=pltpu.CompilerParams(
            dimension_semantics=("arbitrary",),
            vmem_limit_bytes=_VMEM_LIMIT),
    )(x2d)

    # ---- pass 2: x - mean, elementwise, "parallel" (2 TCs on v7x) ---------
    # NOTE: input_output_aliases={1: 0} would halve the HBM footprint here,
    # but x2d can alias the caller's live input via reshape, so we skip it.
    out2d = pl.pallas_call(
        _subtract_kernel,
        out_shape=jax.ShapeDtypeStruct((rows, _LANES), orig_dtype),
        grid=(num_tiles,),
        in_specs=[pl.BlockSpec(memory_space=pltpu.MemorySpace.SMEM),
                  pl.BlockSpec((tile_rows, _LANES), lambda i: (i, 0))],
        out_specs=pl.BlockSpec((tile_rows, _LANES), lambda i: (i, 0)),
        compiler_params=pltpu.CompilerParams(
            dimension_semantics=("parallel",),
            vmem_limit_bytes=_VMEM_LIMIT),
    )(mean, x2d)

    out_flat = out2d.reshape(padded_total)
    if padded_total != total:
        out_flat = out_flat[:total]
    return out_flat.reshape(orig_shape)


if __name__ == "__main__":
    key = jax.random.PRNGKey(0)
    # NCHW input, small shape consistent with a generic layer: (2, 4, 16, 16)
    x = jax.random.normal(key, (2, 4, 16, 16), dtype=jnp.float32)

    y = centered_layer(x)
    y = jax.block_until_ready(y)

    # Correctness check against plain-JAX reference.
    ref = x - jnp.mean(x)
    assert y.shape == x.shape and y.dtype == x.dtype
    assert jnp.allclose(y, ref, atol=1e-5, rtol=1e-5), "mismatch vs reference"
    # Centered output should have ~zero mean.
    assert abs(float(jnp.mean(y))) < 1e-5

    print("KERNEL_OK")
</pallas_src>

<mosaic_0001>
module attributes {stable_mosaic.version = 11 : i64} {
  func.func @_sum_kernel(%arg0: i32, %arg1: memref<4x512xf32, #tpu.memory_space<vmem>>, %arg2: memref<1x1xf32, #tpu.memory_space<vmem>>, %arg3: memref<1x512xf32, #tpu.memory_space<vmem>>) attributes {dimension_semantics = [#tpu.dimension_semantics<arbitrary>], iteration_bounds = array<i64: 1>, scalar_prefetch = 0 : i64, scratch_operands = 1 : i64, tpu.core_type = #tpu.core_type<tc>, window_params = [{transform_indices = @transform_0, window_bounds = array<i64: 4, 512>}, {pipeline_mode = #tpu.pipeline_mode<synchronous>, transform_indices = @transform_1, window_bounds = array<i64: 1, 1>}]} {
    %c0_i32 = arith.constant 0 : i32
    %0 = arith.cmpi eq, %arg0, %c0_i32 : i32
    %1 = arith.extui %0 : i1 to i32
    %c0_i32_0 = arith.constant 0 : i32
    %2 = arith.cmpi ne, %1, %c0_i32_0 : i32
    scf.if %2 {
      %cst_8 = arith.constant 0.000000e+00 : f32
      %12 = vector.broadcast %cst_8 : f32 to vector<1x512xf32>
      %c0_9 = arith.constant 0 : index
      %c0_10 = arith.constant 0 : index
      %13 = vector.load %arg3[%c0_9, %c0_10] : memref<1x512xf32, #tpu.memory_space<vmem>>, vector<1x512xf32>
      tpu.vector_store %arg3[%c0_9, %c0_10], %12 {strides = array<i32>} : memref<1x512xf32, #tpu.memory_space<vmem>>, vector<1x512xf32>,
    } else {
    }
    %c0 = arith.constant 0 : index
    %c0_1 = arith.constant 0 : index
    %3 = vector.load %arg3[%c0, %c0_1] : memref<1x512xf32, #tpu.memory_space<vmem>>, vector<1x512xf32>
    %c0_2 = arith.constant 0 : index
    %c0_3 = arith.constant 0 : index
    %4 = vector.load %arg1[%c0_2, %c0_3] : memref<4x512xf32, #tpu.memory_space<vmem>>, vector<4x512xf32>
    %cst = arith.constant dense<0.000000e+00> : vector<512xf32>
    %5 = vector.multi_reduction <add>, %4, %cst [0] : vector<4x512xf32> to vector<512xf32>
    %6 = vector.shape_cast %5 : vector<512xf32> to vector<1x512xf32>
    %7 = arith.addf %3, %6 : vector<1x512xf32>
    %c0_4 = arith.constant 0 : index
    %c0_5 = arith.constant 0 : index
    %8 = vector.load %arg3[%c0_4, %c0_5] : memref<1x512xf32, #tpu.memory_space<vmem>>, vector<1x512xf32>
    tpu.vector_store %arg3[%c0_4, %c0_5], %7 {strides = array<i32>} : memref<1x512xf32, #tpu.memory_space<vmem>>, vector<1x512xf32>,
    %c0_i32_6 = arith.constant 0 : i32
    %9 = arith.cmpi eq, %arg0, %c0_i32_6 : i32
    %10 = arith.extui %9 : i1 to i32
    %c0_i32_7 = arith.constant 0 : i32
    %11 = arith.cmpi ne, %10, %c0_i32_7 : i32
    scf.if %11 {
      %c0_8 = arith.constant 0 : index
      %c0_9 = arith.constant 0 : index
      %12 = vector.load %arg3[%c0_8, %c0_9] : memref<1x512xf32, #tpu.memory_space<vmem>>, vector<1x512xf32>
      %13 = vector.shape_cast %12 : vector<1x512xf32> to vector<1x1x512xf32>
      %cst_10 = arith.constant dense<0.000000e+00> : vector<1xf32>
      %14 = vector.multi_reduction <add>, %13, %cst_10 [1, 2] : vector<1x1x512xf32> to vector<1xf32>
      %15 = vector.shape_cast %14 : vector<1xf32> to vector<1x1x1xf32>
      %16 = vector.extract %15[0, 0, 0] : f32 from vector<1x1x1xf32>
      %17 = vector.broadcast %16 : f32 to vector<1x1xf32>
      %cst_11 = arith.constant 4.8828125E-4 : f32
      %18 = vector.broadcast %cst_11 : f32 to vector<1x1xf32>
      %19 = arith.mulf %17, %18 : vector<1x1xf32>
      %c0_12 = arith.constant 0 : index
      %c0_13 = arith.constant 0 : index
      %20 = vector.load %arg2[%c0_12, %c0_13] : memref<1x1xf32, #tpu.memory_space<vmem>>, vector<1x1xf32>
      tpu.vector_store %arg2[%c0_12, %c0_13], %19 {strides = array<i32>} : memref<1x1xf32, #tpu.memory_space<vmem>>, vector<1x1xf32>,
    } else {
    }
    return
  }
  func.func @transform_0(%arg0: i32) -> (i32, i32) {
    %c0_i32 = arith.constant 0 : i32
    %c0_i32_0 = arith.constant 0 : i32
    return %arg0, %c0_i32 : i32, i32
  }
  func.func @transform_1(%arg0: i32) -> (i32, i32) {
    %c0_i32 = arith.constant 0 : i32
    %c0_i32_0 = arith.constant 0 : i32
    %c0_i32_1 = arith.constant 0 : i32
    return %c0_i32, %c0_i32_0 : i32, i32
  }
}

</mosaic_0001>

<bundles_post_ra>
// kernel: tpu_custom_call.1
= control target key start
LH: loop header
LB: loop body
LE: loop exit
PB: predicated region body
PF: predicated region fallthrough
CT: control target
= control target key end

     0   :  { %6 = vsyncpa [#allocation4], 0  ;;  %s266_s0 = inlined_call_operand.hbm [shape: f32[4,512], index: 0, kind: input, shape index: {}]   ;;  %s267_s1 = inlined_call_operand.hbm [shape: f32[1,1], index: 1, kind: output, shape index: {}]  }
   0x1   :  { %7 = vsyncpa [#allocation5], 0  ;;  %s220_s6 = smov [#allocation3]   ;;  %s172_s10 = scalar_lea.hbm %s266_s0, 256 }
   0x2   :  { %s14_s7 = sshll.u32 %s220_s6, 4  ;;  %p173_p0 = scmp.ne.s32.totalorder %s266_s0, %s172_s10  ;;  %s15_s7 = int_to_ptr.vmem [resolvable:$true] %s14_s7 }
   0x3   :  { %p176_p1 = scmp.lt.u32.totalorder %s172_s10, %s266_s0 }
   0x5   :  { %p178_p2 = pnand %p176_p1, %p173_p0 }
   0x7   :  { %181 = shalt.err (!%p178_p2)
}
   0x8   :  { %s182_s15 = scalar_lea.vmem %s15_s7, 256  ;;  %p187_p4 = scmp.lt.s32.totalorder %s15_s7, %s15_s7 }
   0x9   :  { %p183_p3 = scmp.ne.s32.totalorder %s15_s7, %s182_s15  ;;  %p188_p5 = scmp.lt.s32.totalorder %s182_s15, %s182_s15 }
   0xb   :  { %p189_p6 = por %p188_p5, %p187_p4 }
   0xd   :  { %p190_p7 = pnand %p189_p6, %p183_p3 }
   0xf   :  { %193 = shalt.err (!%p190_p7)
}
  0x10   :  { %17 = dma.hbm_to_vmem [thread:$0]  %s266_s0, 256, %s15_s7, [#allocation4]  }
  0x11   :  { %216 = dma.done.wait [#allocation4], 256  }
  0x12   :  { %217 = vsyncadd [#allocation4], 4294967040  ;;  %v25_v0 = vlaneseq  ;;  %v221_v2 = vmov 0.0   ;;  %vm39_vm1 = vcmask 1043456   ;;  %v31_v3 = vld [vmem:[#allocation3] sm:$0xff]  ;;  %v32_v4 = vld [vmem:[#allocation3 + $0x8] sm:$0xff] }
  0x13   :  { %v35_v5 = vcombine.high %v31_v3, %v31_v3  ;;  %v36_v6 = vcombine.high %v32_v4, %v32_v4  ;;  %v40_v7 = vsel %vm39_vm1, %v31_v3, 0.0  ;;  %v54_v8 = vsel %vm39_vm1, %v32_v4, 0.0  ;;  %s223_s0 = smov [#allocation6]  }
  0x14   :  { %vm246_vm0 = vcmp.lt.s32.totalorder %v25_v0, 512  ;;  %v41_v9 = vrot.slane %v40_v7, 4  ;;  %v55_v10 = vrot.slane %v54_v8, 4  ;;  %v222_v17 = vmov 1966171168   ;;  %s155_s18 = sshll.u32 %s223_s0, 4  ;;  %s156_s18 = int_to_ptr.vmem [resolvable:$true] %s155_s18 }
  0x15   :  { %29 = vst.msk [vmem:[#allocation2] sm:$0xf] %vm246_vm0, %v221_v2  ;;  %v47_v11 = vsel %vm39_vm1, %v35_v5, 0.0  ;;  %v61_v12 = vsel %vm39_vm1, %v36_v6, 0.0  ;;  %v75_v18 = vunpack.c.l.s4 %v222_v17  ;;  %v78_v28 = vshrl.u32 %v25_v0, 7  ;;  %s194_s20 = scalar_lea.vmem %s156_s18, 16  ;;  %p199_p9 = scmp.lt.s32.totalorder %s156_s18, %s156_s18 }
  0x16   :  { %v42_v13 = vadd.f32 %v41_v9, %v40_v7  ;;  %v48_v14 = vrot.slane %v47_v11, 4  ;;  %v56_v15 = vadd.f32 %v55_v10, %v54_v8  ;;  %v62_v16 = vrot.slane %v61_v12, 4  ;;  %p195_p8 = scmp.ne.s32.totalorder %s156_s18, %s194_s20  ;;  %s198_s21 = scalar_lea.vmem %s156_s18, 32 }
  0x17   :  { %v76_v27 = vunpack.c.0.s8 %v75_v18  ;;  %v110_v48 = vsub.s32 0, %v78_v28  ;;  %v114_v49 = vsub.s32 1, %v78_v28  ;;  %v118_v50 = vsub.s32 2, %v78_v28  ;;  %p200_p10 = scmp.lt.s32.totalorder %s198_s21, %s194_s20 }
  0x18   :  { %v43_v19 = vrot.slane %v42_v13, 2  ;;  %v49_v20 = vadd.f32 %v48_v14, %v47_v11  ;;  %v57_v21 = vrot.slane %v56_v15, 2  ;;  %v63_v22 = vadd.f32 %v62_v16, %v61_v12 }
  0x19   :  { %v79_v39 = vsub.s32 %v76_v27, %v78_v28  ;;  %v122_v51 = vsub.s32 3, %v78_v28  ;;  %vm128_vm2 = vcmask 1040384   ;;  %vm147_vm3 = vcmask 0   ;;  %p201_p11 = por %p200_p10, %p199_p9 }
  0x1a   :  { %v44_v23 = vadd.f32 %v43_v19, %v42_v13  ;;  %v50_v24 = vrot.slane %v49_v20, 2  ;;  %v58_v25 = vadd.f32 %v57_v21, %v56_v15  ;;  %v64_v26 = vrot.slane %v63_v22, 2 }
  0x1b   :  { %p202_p12 = pnand %p201_p11, %p195_p8 }
  0x1c   :  { %v45_v29 = vrot.slane %v44_v23, 1  ;;  %v51_v30 = vadd.f32 %v50_v24, %v49_v20  ;;  %v59_v31 = vrot.slane %v58_v25, 1  ;;  %v65_v32 = vadd.f32 %v64_v26, %v63_v22  ;;  %v30_v45 = vld [vmem:[#allocation2] sm:$0xf] }
  0x1e   :  { %v46_v33 = vadd.f32 %v45_v29, %v44_v23  ;;  %v52_v34 = vrot.slane %v51_v30, 1  ;;  %v60_v35 = vadd.f32 %v59_v31, %v58_v25  ;;  %v66_v36 = vrot.slane %v65_v32, 1 }
  0x20   :  { %v53_v37 = vadd.f32 %v52_v34, %v51_v30  ;;  %v67_v38 = vadd.f32 %v66_v36, %v65_v32 }
  0x22   :  { %v72_v40 = vcombine.low %v46_v33, %v53_v37  ;;  %v73_v41 = vcombine.low %v60_v35, %v67_v38 }
  0x24   :  { %v80_v42 = vrot.slane %v72_v40, %v79_v39  ;;  %v87_v43 = vrot.slane %v73_v41, %v79_v39 }
  0x26   :  { %v88_v44 = vcombine.low %v80_v42, %v87_v43 }
  0x28   :  { %v95_v46 = vrot.slane %v88_v44, %v79_v39 }
  0x2a   :  { %v97_v47 = vadd.f32 %v95_v46, %v30_v45 }
  0x2c   :  { %102 = vst.msk [vmem:[#allocation2] sm:$0xf] %vm246_vm0, %v97_v47 }
  0x33   :  { %v106_v52 = vld [vmem:[#allocation2] sm:$0xf] }
  0x34   :  { %v111_v53 = vrot.slane %v106_v52, %v110_v48  ;;  %v115_v54 = vrot.slane %v106_v52, %v114_v49  ;;  %v119_v55 = vrot.slane %v106_v52, %v118_v50  ;;  %v123_v56 = vrot.slane %v106_v52, %v122_v51 }
  0x36   :  { %v129_v57 = vsel %vm128_vm2, %v111_v53, 0.0  ;;  %v130_v58 = vsel %vm128_vm2, %v115_v54, 0.0  ;;  %v132_v59 = vsel %vm128_vm2, %v119_v55, 0.0  ;;  %v134_v61 = vsel %vm128_vm2, %v123_v56, 0.0 }
  0x37   :  { %v131_v60 = vadd.f32 %v130_v58, %v129_v57 }
  0x39   :  { %v133_v62 = vadd.f32 %v132_v59, %v131_v60 }
  0x3b   :  { %v135_v63 = vadd.f32 %v134_v61, %v133_v62 }
  0x3d   :  { %136 = vadd.xlane.f32.xlu0 %v135_v63 }
  0xca   :  { %v137_v0 = vpop.xlane.xlu0 %136 }
  0xcb   :  { %v138_v1 = vrot.slane %v137_v0, 4 }
  0xcd   :  { %v139_v2 = vadd.f32 %v138_v1, %v137_v0 }
  0xcf   :  { %v140_v3 = vrot.slane %v139_v2, 2 }
  0xd1   :  { %v141_v4 = vadd.f32 %v140_v3, %v139_v2 }
  0xd3   :  { %v142_v5 = vrot.slane %v141_v4, 1 }
  0xd5   :  { %v143_v6 = vadd.f32 %v142_v5, %v141_v4 }
  0xd7   :  { %164 = vpush %v143_v6 }
 0x108   :  { %s165_s19 = spop %164 }
 0x109   :  { %v145_v7 = vstv %s165_s19 }
 0x10a   :  { %v146_v8 = vmul.f32 0.00048828125, %v145_v7 }
 0x10c   :  { %148 = vst.msk [vmem:[#allocation6] sm:$0x1] %vm147_vm3, %v146_v8 }
 0x10d   :  { %205 = shalt.err (!%p202_p12)
}
 0x10e   :  { %s206_s24 = scalar_lea.hbm %s267_s1, 16 }
 0x10f   :  { %p207_p13 = scmp.ne.s32.totalorder %s267_s1, %s206_s24  ;;  %p210_p0 = scmp.lt.u32.totalorder %s206_s24, %s267_s1 }
 0x111   :  { %p212_p1 = pnand %p210_p0, %p207_p13 }
 0x113   :  { %215 = shalt.err (!%p212_p1)
}
 0x114   :  { %158 = dma.vmem_to_hbm [thread:$0]  %s156_s18, 16, %s267_s1, [#allocation5]  }
 0x115   :  { %218 = dma.done.wait [#allocation5], 16  }
 0x116   :  { %219 = vsyncadd [#allocation5], 4294967280 }
 0x117   :  { %162 = vsyncpa [#allocation4], 1 }
 0x118   :  { %163 = vsyncpa [#allocation5], 1 }

</bundles_post_ra>
